<compile_context>
chip_gen: v7x
topology: tpu7x:2x2x1
jax: 0.10.0
libtpu: 0.0.40
codegen_flags: <defaults>
</compile_context>

<pallas_src>
import functools
import math

import jax
import jax.numpy as jnp
from jax.experimental import pallas as pl
from jax.experimental.pallas import tpu as pltpu


def _round_up(n, m):
    return ((n + m - 1) // m) * m


def _pad_to(arr, target_shape):
    pads = [(0, t - s) for s, t in zip(arr.shape, target_shape)]
    if any(p[1] for p in pads):
        arr = jnp.pad(arr, pads)
    return arr


def _mlp_kernel(x_ref, w1_ref, b1_ref, w2_ref, b2_ref, o_ref, *,
                compute_dtype, approximate_gelu):
    x = x_ref[...]                                   # (TM, C_in), native dtype
    if x.dtype != compute_dtype:
        x = x.astype(compute_dtype)                  # in-kernel cast (VPU, free vs HBM)

    # fc1 (MXU, f32 accumulation) + bias in f32
    h = jnp.dot(x, w1_ref[...], preferred_element_type=jnp.float32)
    h = h + b1_ref[...]                              # (TM, H_p), f32

    if approximate_gelu:
        # tanh-approx GELU: tanh goes to the EUP slot instead of a VALU erf polynomial.
        c0 = jnp.float32(math.sqrt(2.0 / math.pi))
        c1 = jnp.float32(0.044715)
        h = 0.5 * h * (1.0 + jnp.tanh(c0 * (h + c1 * h * h * h)))
    else:
        # exact GELU (PyTorch nn.GELU() default): 0.5 * x * (1 + erf(x / sqrt(2)))
        h = 0.5 * h * (1.0 + jax.lax.erf(h * jnp.float32(1.0 / math.sqrt(2.0))))

    # fc2 (cast hidden to MXU operand dtype, accumulate in f32) + bias
    y = jnp.dot(h.astype(w2_ref.dtype), w2_ref[...], preferred_element_type=jnp.float32)
    y = y + b2_ref[...]                              # (TM, C_out), f32

    # dropout (eval mode) == identity
    o_ref[...] = y.astype(o_ref.dtype)


def mlp_pallas(x, w1, b1, w2, b2, *, compute_dtype=jnp.bfloat16,
               approximate_gelu=False, tm_max=512):
    """x: (..., C_in) -> (..., C_out). fc1 + GELU + fc2 fused in one Pallas kernel.

    Weights are in (in, out) layout (transposed vs. nn.Linear) so the kernel
    computes x @ W + b directly.
    """
    orig_shape = x.shape
    c_in = orig_shape[-1]
    h_dim = w1.shape[1]
    c_out = w2.shape[1]
    out_dtype = x.dtype

    x2d = x.reshape(-1, c_in)                        # (M, C_in), metadata-only reshape
    M = x2d.shape[0]

    # Pad only the hidden dim (weights/biases are tiny, one-time, exactly neutral).
    h_p = _round_up(h_dim, 128)
    w1_p = _pad_to(w1, (c_in, h_p)).astype(compute_dtype)
    w2_p = _pad_to(w2, (h_p, c_out)).astype(compute_dtype)
    b1_p = _pad_to(b1.reshape(1, h_dim), (1, h_p)).astype(jnp.float32)
    b2_p = b2.reshape(1, c_out).astype(jnp.float32)

    # Row tile: multiple of 16 (bf16 sublane packing), >= 2 grid steps when M allows
    # (v7x megacore), never exceeding the sublane-rounded row count.
    tm = min(tm_max,
             max(16, _round_up(pl.cdiv(M, 2), 16)),
             max(8, _round_up(M, 8)))

    # Cap tm so resident (double-buffered) weights + double-buffered x/out tiles and
    # f32 intermediates fit the tightest scoped-VMEM default (16 MiB on v5e).
    cdt_size = jnp.dtype(compute_dtype).itemsize
    x_size = jnp.dtype(x2d.dtype).itemsize
    o_size = jnp.dtype(out_dtype).itemsize
    resident_w = 2 * ((c_in * h_p + h_p * c_out) * cdt_size + (h_p + c_out) * 4)
    per_row = 2 * (c_in * x_size + c_out * o_size) + (h_p + c_out) * 4
    vmem_budget = 14 * 1024 * 1024
    tm_cap = (vmem_budget - resident_w) // max(per_row, 1)
    if tm_cap >= 16:
        tm = min(tm, max(16, (tm_cap // 16) * 16))

    grid = (pl.cdiv(M, tm),)                         # ragged last block handled by Pallas

    # Advisory cost estimate from the TRUE (unpadded) problem size.
    flops = 2 * M * (c_in * h_dim + h_dim * c_out)
    transcendentals = M * h_dim if approximate_gelu else 0
    bytes_accessed = (
        M * c_in * x_size                            # x
        + (c_in * h_p + h_p * c_out) * cdt_size      # weights
        + (h_p + c_out) * 4                          # biases
        + M * c_out * o_size                         # output
    )

    kernel = functools.partial(_mlp_kernel,
                               compute_dtype=compute_dtype,
                               approximate_gelu=approximate_gelu)

    out2d = pl.pallas_call(
        kernel,
        out_shape=jax.ShapeDtypeStruct((M, c_out), out_dtype),
        grid=grid,
        in_specs=[
            pl.BlockSpec((tm, c_in), lambda i: (i, 0)),      # x: tiled over rows
            pl.BlockSpec((c_in, h_p), lambda i: (0, 0)),     # w1: VMEM-resident
            pl.BlockSpec((1, h_p), lambda i: (0, 0)),        # b1: VMEM-resident
            pl.BlockSpec((h_p, c_out), lambda i: (0, 0)),    # w2: VMEM-resident
            pl.BlockSpec((1, c_out), lambda i: (0, 0)),      # b2: VMEM-resident
        ],
        out_specs=pl.BlockSpec((tm, c_out), lambda i: (i, 0)),
        compiler_params=pltpu.CompilerParams(
            dimension_semantics=("parallel",),
        ),
        cost_estimate=pl.CostEstimate(
            flops=flops,
            transcendentals=transcendentals,
            bytes_accessed=bytes_accessed,
        ),
    )(x2d, w1_p, b1_p, w2_p, b2_p)

    return out2d.reshape(orig_shape[:-1] + (c_out,))


def init_linear_params(key, fan_in, fan_out, dtype=jnp.float32):
    """Init mimicking nn.Linear (uniform +/- 1/sqrt(fan_in)); weight returned as (in, out)."""
    k_w, k_b = jax.random.split(key)
    bound = 1.0 / math.sqrt(fan_in)
    w = jax.random.uniform(k_w, (fan_in, fan_out), dtype, minval=-bound, maxval=bound)
    b = jax.random.uniform(k_b, (fan_out,), dtype, minval=-bound, maxval=bound)
    return w, b


def _ref_mlp(x, w1, b1, w2, b2):
    h = x @ w1 + b1
    h = 0.5 * h * (1.0 + jax.lax.erf(h / jnp.sqrt(2.0)))
    return h @ w2 + b2


if __name__ == "__main__":
    # Small shapes consistent with the module's forward: (batch, seq, in_features)
    batch, seq = 2, 8
    in_features, hidden_features, out_features = 32, 64, 32

    key = jax.random.PRNGKey(0)
    k_x, k_fc1, k_fc2, k_x2 = jax.random.split(key, 4)

    x = jax.random.normal(k_x, (batch, seq, in_features), dtype=jnp.float32)
    w1, b1 = init_linear_params(k_fc1, in_features, hidden_features)
    w2, b2 = init_linear_params(k_fc2, hidden_features, out_features)

    ref = _ref_mlp(x, w1, b1, w2, b2)

    # 1) Exact f32 path (erf GELU): matches the reference to 1e-5.
    out_f32 = mlp_pallas(x, w1, b1, w2, b2, compute_dtype=jnp.float32)
    out_f32 = jax.block_until_ready(out_f32)
    assert out_f32.shape == (batch, seq, out_features)
    assert jnp.allclose(out_f32, ref, atol=1e-5, rtol=1e-5), "f32 mismatch vs reference"

    # 2) Default fast path: bf16 MXU operands, f32 accumulation/epilogue.
    out_bf16 = mlp_pallas(x, w1, b1, w2, b2)
    out_bf16 = jax.block_until_ready(out_bf16)
    assert out_bf16.shape == (batch, seq, out_features)
    assert jnp.allclose(out_bf16, ref, atol=5e-2, rtol=5e-2), "bf16 mismatch vs reference"

    # 3) bf16 + tanh-approx GELU (EUP path).
    out_tanh = mlp_pallas(x, w1, b1, w2, b2, approximate_gelu=True)
    out_tanh = jax.block_until_ready(out_tanh)
    assert jnp.allclose(out_tanh, ref, atol=5e-2, rtol=5e-2), "tanh-GELU mismatch vs reference"

    # 4) Ragged row count (M not a multiple of tm): exercises the cdiv grid +
    #    masked boundary block instead of wrapper-side pad/slice.
    x_rag = jax.random.normal(k_x2, (2, 10, in_features), dtype=jnp.float32)
    ref_rag = _ref_mlp(x_rag, w1, b1, w2, b2)
    out_rag = mlp_pallas(x_rag, w1, b1, w2, b2, compute_dtype=jnp.float32)
    out_rag = jax.block_until_ready(out_rag)
    assert out_rag.shape == (2, 10, out_features)
    assert jnp.allclose(out_rag, ref_rag, atol=1e-5, rtol=1e-5), "ragged-M mismatch vs reference"

    print("KERNEL_OK")
</pallas_src>

<mosaic_0001>
module attributes {stable_mosaic.version = 11 : i64} {
  func.func @_mlp_kernel(%arg0: i32, %arg1: memref<16x32xf32, #tpu.memory_space<vmem>>, %arg2: memref<32x128xf32, #tpu.memory_space<vmem>>, %arg3: memref<1x128xf32, #tpu.memory_space<vmem>>, %arg4: memref<128x32xf32, #tpu.memory_space<vmem>>, %arg5: memref<1x32xf32, #tpu.memory_space<vmem>>, %arg6: memref<16x32xf32, #tpu.memory_space<vmem>>) attributes {dimension_semantics = [#tpu.dimension_semantics<parallel>], iteration_bounds = array<i64: 1>, scalar_prefetch = 0 : i64, scratch_operands = 0 : i64, tpu.core_type = #tpu.core_type<tc>, window_params = [{transform_indices = @transform_0, window_bounds = array<i64: 16, 32>}, {pipeline_mode = #tpu.pipeline_mode<synchronous>, transform_indices = @transform_1, window_bounds = array<i64: 32, 128>}, {pipeline_mode = #tpu.pipeline_mode<synchronous>, transform_indices = @transform_2, window_bounds = array<i64: 1, 128>}, {pipeline_mode = #tpu.pipeline_mode<synchronous>, transform_indices = @transform_3, window_bounds = array<i64: 128, 32>}, {pipeline_mode = #tpu.pipeline_mode<synchronous>, transform_indices = @transform_4, window_bounds = array<i64: 1, 32>}, {transform_indices = @transform_5, window_bounds = array<i64: 16, 32>}]} {
    %c0 = arith.constant 0 : index
    %c0_0 = arith.constant 0 : index
    %0 = vector.load %arg1[%c0, %c0_0] : memref<16x32xf32, #tpu.memory_space<vmem>>, vector<16x32xf32>
    %c0_1 = arith.constant 0 : index
    %c0_2 = arith.constant 0 : index
    %1 = vector.load %arg2[%c0_1, %c0_2] : memref<32x128xf32, #tpu.memory_space<vmem>>, vector<32x128xf32>
    %cst = arith.constant dense<0.000000e+00> : vector<16x128xf32>
    %2 = tpu.matmul %0, %1, %cst {dimension_numbers = #tpu.dot_dimension_numbers<[1], [0], [0], [1], [0, 0, 1, 1], [], []>} : vector<16x32xf32>, vector<32x128xf32>, vector<16x128xf32> -> vector<16x128xf32>
    %c0_3 = arith.constant 0 : index
    %c0_4 = arith.constant 0 : index
    %3 = vector.load %arg3[%c0_3, %c0_4] : memref<1x128xf32, #tpu.memory_space<vmem>>, vector<1x128xf32>
    %4 = vector.broadcast %3 : vector<1x128xf32> to vector<16x128xf32>
    %5 = arith.addf %2, %4 : vector<16x128xf32>
    %cst_5 = arith.constant 5.000000e-01 : f32
    %6 = vector.broadcast %cst_5 : f32 to vector<16x128xf32>
    %7 = arith.mulf %6, %5 : vector<16x128xf32>
    %cst_6 = arith.constant 0.707106769 : f32
    %8 = vector.broadcast %cst_6 : f32 to vector<16x128xf32>
    %9 = arith.mulf %5, %8 : vector<16x128xf32>
    %10 = math.erf %9 : vector<16x128xf32>
    %cst_7 = arith.constant 1.000000e+00 : f32
    %11 = vector.broadcast %cst_7 : f32 to vector<16x128xf32>
    %12 = arith.addf %11, %10 : vector<16x128xf32>
    %13 = arith.mulf %7, %12 : vector<16x128xf32>
    %c0_8 = arith.constant 0 : index
    %c0_9 = arith.constant 0 : index
    %14 = vector.load %arg4[%c0_8, %c0_9] : memref<128x32xf32, #tpu.memory_space<vmem>>, vector<128x32xf32>
    %cst_10 = arith.constant dense<0.000000e+00> : vector<16x32xf32>
    %15 = tpu.matmul %13, %14, %cst_10 {dimension_numbers = #tpu.dot_dimension_numbers<[1], [0], [0], [1], [0, 0, 1, 1], [], []>} : vector<16x128xf32>, vector<128x32xf32>, vector<16x32xf32> -> vector<16x32xf32>
    %c0_11 = arith.constant 0 : index
    %c0_12 = arith.constant 0 : index
    %16 = vector.load %arg5[%c0_11, %c0_12] : memref<1x32xf32, #tpu.memory_space<vmem>>, vector<1x32xf32>
    %17 = vector.broadcast %16 : vector<1x32xf32> to vector<16x32xf32>
    %18 = arith.addf %15, %17 : vector<16x32xf32>
    %c0_13 = arith.constant 0 : index
    %c0_14 = arith.constant 0 : index
    %19 = vector.load %arg6[%c0_13, %c0_14] : memref<16x32xf32, #tpu.memory_space<vmem>>, vector<16x32xf32>
    tpu.vector_store %arg6[%c0_13, %c0_14], %18 {strides = array<i32>} : memref<16x32xf32, #tpu.memory_space<vmem>>, vector<16x32xf32>,
    return
  }
  func.func @transform_0(%arg0: i32) -> (i32, i32) {
    %c0_i32 = arith.constant 0 : i32
    %c0_i32_0 = arith.constant 0 : i32
    return %arg0, %c0_i32 : i32, i32
  }
  func.func @transform_1(%arg0: i32) -> (i32, i32) {
    %c0_i32 = arith.constant 0 : i32
    %c0_i32_0 = arith.constant 0 : i32
    %c0_i32_1 = arith.constant 0 : i32
    return %c0_i32, %c0_i32_0 : i32, i32
  }
  func.func @transform_2(%arg0: i32) -> (i32, i32) {
    %c0_i32 = arith.constant 0 : i32
    %c0_i32_0 = arith.constant 0 : i32
    %c0_i32_1 = arith.constant 0 : i32
    return %c0_i32, %c0_i32_0 : i32, i32
  }
  func.func @transform_3(%arg0: i32) -> (i32, i32) {
    %c0_i32 = arith.constant 0 : i32
    %c0_i32_0 = arith.constant 0 : i32
    %c0_i32_1 = arith.constant 0 : i32
    return %c0_i32, %c0_i32_0 : i32, i32
  }
  func.func @transform_4(%arg0: i32) -> (i32, i32) {
    %c0_i32 = arith.constant 0 : i32
    %c0_i32_0 = arith.constant 0 : i32
    %c0_i32_1 = arith.constant 0 : i32
    return %c0_i32, %c0_i32_0 : i32, i32
  }
  func.func @transform_5(%arg0: i32) -> (i32, i32) {
    %c0_i32 = arith.constant 0 : i32
    %c0_i32_0 = arith.constant 0 : i32
    return %arg0, %c0_i32 : i32, i32
  }
}

</mosaic_0001>

<bundles_post_ra>
// kernel: tpu_custom_call.1
= control target key start
LH: loop header
LB: loop body
LE: loop exit
PB: predicated region body
PF: predicated region fallthrough
CT: control target
= control target key end

     0   :  { %vm34_vm0 = vcmask 261120   ;;  %s508_s0 = inlined_call_operand.vmem [shape: f32[16,32], index: 0, kind: input, shape index: {}]   ;;  %s509_s1 = inlined_call_operand.vmem [shape: f32[32,128], index: 1, kind: input, shape index: {}]   ;;  %s510_s2 = inlined_call_operand.vmem [shape: f32[1,128], index: 2, kind: input, shape index: {}]   ;;  %s511_s3 = inlined_call_operand.vmem [shape: f32[128,32], index: 3, kind: input, shape index: {}]   ;;  %s512_s4 = inlined_call_operand.vmem [shape: f32[1,32], index: 4, kind: input, shape index: {}]   ;;  %s513_s5 = inlined_call_operand.hbm [shape: f32[16,32], index: 5, kind: output, shape index: {}]  }
   0x1   :  { %v23_v0 = vld [vmem:[%s509_s1] sm:$0xff]  ;;  %v24_v1 = vld [vmem:[%s509_s1 + $0x8] sm:$0xff]  ;;  %v25_v2 = vld [vmem:[%s509_s1 + $0x10] sm:$0xff] }
   0x2   :  { %v316_v3 = vpack.c.bf16 %v24_v1, %v23_v0  ;;  %v26_v4 = vld [vmem:[%s509_s1 + $0x18] sm:$0xff]  ;;  %v21_v5 = vld [vmem:[%s508_s0] sm:$0xff]  ;;  %v127_v8 = vld [vmem:[%s511_s3 + $0x8] sm:$0xff] }
   0x3   :  { %v320_v6 = vpack.c.bf16 %v26_v4, %v25_v2  ;;  %278 = vmatprep.mubr.msk.f32.mxu0 %vm34_vm0, %v21_v5  ;;  %v126_v7 = vld [vmem:[%s511_s3] sm:$0xff]  ;;  %v128_v9 = vld [vmem:[%s511_s3 + $0x10] sm:$0xff]  ;;  %v129_v11 = vld [vmem:[%s511_s3 + $0x18] sm:$0xff] }
   0x4   :  { %317 = vmatprep.subr.bf16.mxu0 %v316_v3  ;;  %v324_v10 = vpack.c.bf16 %v127_v8, %v126_v7  ;;  %v328_v12 = vpack.c.bf16 %v129_v11, %v128_v9  ;;  %v130_v13 = vld [vmem:[%s511_s3 + $0x20] sm:$0xff]  ;;  %v131_v14 = vld [vmem:[%s511_s3 + $0x28] sm:$0xff] }
   0x5   :  { %319 = vmatpush3.bf16.msra.mxu0 %v316_v3 }
   0x6   :  { %10 = vsyncpa [#allocation3], 0  ;;  %321 = vmatprep.subr.bf16.mxu0 %v320_v6  ;;  %325 = vmatprep.subr.bf16.mxu1 %v324_v10  ;;  %v332_v15 = vpack.c.bf16 %v131_v14, %v130_v13  ;;  %v22_v16 = vld [vmem:[%s508_s0 + $0x8] sm:$0xff]  ;;  %v132_v17 = vld [vmem:[%s511_s3 + $0x30] sm:$0xff]  ;;  %s387_s11 = smov [#allocation2]  }
   0x7   :  { %327 = vmatpush3.bf16.msra.mxu1 %v324_v10  ;;  %v133_v18 = vld [vmem:[%s511_s3 + $0x38] sm:$0xff]  ;;  %v134_v20 = vld [vmem:[%s511_s3 + $0x40] sm:$0xff]  ;;  %v135_v21 = vld [vmem:[%s511_s3 + $0x48] sm:$0xff]  ;;  %s231_s12 = sshll.u32 %s387_s11, 4  ;;  %s232_s12 = int_to_ptr.vmem [resolvable:$true] %s231_s12 }
   0x8   :  { %329 = vmatprep.subr.bf16.mxu1 %v328_v12  ;;  %v336_v19 = vpack.c.bf16 %v133_v18, %v132_v17  ;;  %v340_v22 = vpack.c.bf16 %v135_v21, %v134_v20  ;;  %v136_v23 = vld [vmem:[%s511_s3 + $0x50] sm:$0xff]  ;;  %v137_v24 = vld [vmem:[%s511_s3 + $0x58] sm:$0xff]  ;;  %v138_v26 = vld [vmem:[%s511_s3 + $0x60] sm:$0xff]  ;;  %s363_s13 = scalar_lea.vmem %s232_s12, 256  ;;  %p368_p1 = scmp.lt.s32.totalorder %s232_s12, %s232_s12 }
   0x9   :  { %323 = vmatpush3.bf16.msra.mxu0 %v320_v6  ;;  %v344_v25 = vpack.c.bf16 %v137_v24, %v136_v23  ;;  %v139_v27 = vld [vmem:[%s511_s3 + $0x68] sm:$0xff]  ;;  %v140_v29 = vld [vmem:[%s511_s3 + $0x70] sm:$0xff]  ;;  %v141_v30 = vld [vmem:[%s511_s3 + $0x78] sm:$0xff]  ;;  %p364_p0 = scmp.ne.s32.totalorder %s232_s12, %s363_s13  ;;  %p369_p2 = scmp.lt.s32.totalorder %s363_s13, %s363_s13 }
   0xa   :  { %v348_v28 = vpack.c.bf16 %v139_v27, %v138_v26  ;;  %v352_v31 = vpack.c.bf16 %v141_v30, %v140_v29  ;;  %v242_v32 = vld [vmem:[%s510_s2] ss:$0 sm:$0xff] }
   0xb   :  { %331 = vmatpush3.bf16.msra.mxu1 %v328_v12  ;;  %v245_v47 = vld [vmem:[%s512_s4] ss:$0 sm:$0xff]  ;;  %p370_p3 = por %p369_p2, %p368_p1 }
   0xc   :  { %279 = vmatmul.mubr.msk.f32.vlgmr.msra.gmra.mrb[0].mxu0 %vm34_vm0, %v22_v16  ;;  %333 = vmatprep.subr.bf16.mxu1 %v332_v15 }
   0xd   :  { %p371_p4 = pnand %p370_p3, %p364_p0 }
   0xf   :  { %335 = vmatpush3.bf16.msra.mxu1 %v332_v15 }
  0x10   :  { %337 = vmatprep.subr.bf16.mxu1 %v336_v19 }
  0x13   :  { %339 = vmatpush3.bf16.msra.mxu1 %v336_v19 }
  0x14   :  { %341 = vmatprep.subr.bf16.mxu1 %v340_v22 }
  0x17   :  { %343 = vmatpush3.bf16.msra.mxu1 %v340_v22 }
  0x18   :  { %345 = vmatprep.subr.bf16.mxu1 %v344_v25 }
  0x1b   :  { %347 = vmatpush3.bf16.msra.mxu1 %v344_v25 }
  0x1c   :  { %349 = vmatprep.subr.bf16.mxu1 %v348_v28 }
  0x1f   :  { %351 = vmatpush3.bf16.msra.mxu1 %v348_v28 }
  0x20   :  { %353 = vmatprep.subr.bf16.mxu1 %v352_v31 }
  0x23   :  { %355 = vmatpush3.bf16.msra.mxu1 %v352_v31 }
  0xdf   :  { %v280_v33 = vpop.f32.mrb[0].mxu0 }
  0xe0   :  { %v113_v34 = vadd.f32 %v280_v33, %v242_v32  ;;  %v107_v35 = vpop.f32.mrb[1].mxu0 }
  0xe1   :  { %v108_v36 = vadd.f32 %v242_v32, %v107_v35 }
  0xe2   :  { %v119_v37 = vmul.f32 0.70710677, %v113_v34  ;;  %v117_v44 = vmul.f32 0.5, %v113_v34 }
  0xe3   :  { %v118_v38 = vmul.f32 0.70710677, %v108_v36  ;;  %v116_v42 = vmul.f32 0.5, %v108_v36 }
  0xe4   :  { %359 = verf.f32 %v119_v37 }
  0xe5   :  { %361 = verf.f32 %v118_v38 }
  0xee   :  { %v360_v39 = vpop.eup %359 }
  0xef   :  { %v362_v40 = vpop.eup %361  ;;  %v123_v41 = vadd.f32 1.0, %v360_v39 }
  0xf0   :  { %v122_v43 = vadd.f32 1.0, %v362_v40 }
  0xf1   :  { %v125_v46 = vmul.f32 %v123_v41, %v117_v44 }
  0xf2   :  { %v124_v45 = vmul.f32 %v122_v43, %v116_v42 }
  0xf4   :  { %313 = vmatprep.mubr.f32.mxu1 %v124_v45 }
  0xf5   :  { %314 = vmatmul.mubr.f32.vlgmr.msra.gmra.mrb[0].mxu1 %v125_v46 }
 0x1c8   :  { %v315_v48 = vpop.f32.mrb[0].mxu1 }
 0x1c9   :  { %v221_v49 = vadd.f32 %v315_v48, %v245_v47  ;;  %v215_v50 = vpop.f32.mrb[1].mxu1 }
 0x1ca   :  { %v216_v51 = vadd.f32 %v245_v47, %v215_v50 }
 0x1cb   :  { %225 = vst.msk [vmem:[#allocation2 + $0x8] sm:$0xff] %vm34_vm0, %v221_v49 }
 0x1cc   :  { %224 = vst.msk [vmem:[#allocation2] sm:$0xff] %vm34_vm0, %v216_v51 }
 0x1cd   :  { %374 = shalt.err (!%p371_p4)
}
 0x1ce   :  { %s375_s15 = scalar_lea.hbm %s513_s5, 256 }
 0x1cf   :  { %p376_p5 = scmp.ne.s32.totalorder %s513_s5, %s375_s15  ;;  %p379_p6 = scmp.lt.u32.totalorder %s375_s15, %s513_s5 }
 0x1d1   :  { %p381_p7 = pnand %p379_p6, %p376_p5 }
 0x1d3   :  { %384 = shalt.err (!%p381_p7)
}
 0x1d4   :  { %s388_s20 = smov 128   ;;  %s389_s21 = smov 8  }
 0x1d5   :  { %237 = dma.vmem_to_hbm [thread:$0]  %s232_s12, 256, %s513_s5, [#allocation3], %s388_s20, %s388_s20, %s389_s21  }
 0x1d6   :  { %385 = dma.done.wait [#allocation3], 256  }
 0x1d7   :  { %386 = vsyncadd [#allocation3], 4294967040 }
 0x1d8   :  { %241 = vsyncpa [#allocation3], 1 }

</bundles_post_ra>
